<compile_context>
chip_gen: v7x
topology: tpu7x:2x2x1
jax: 0.10.0
libtpu: 0.0.40
codegen_flags: <defaults>
</compile_context>

<pallas_src>
import functools

import jax
import jax.numpy as jnp
from jax.experimental import pallas as pl
from jax.experimental.pallas import tpu as pltpu


# ----------------------------------------------------------------------------
# small helpers (traced INTO kernels)
# ----------------------------------------------------------------------------
def _round_up(x, m):
    return (x + m - 1) // m * m


def _ln(x, g, b, eps=1e-12):
    mu = jnp.mean(x, axis=-1, keepdims=True)
    var = jnp.mean((x - mu) ** 2, axis=-1, keepdims=True)
    return (x - mu) * jax.lax.rsqrt(var + eps) * g + b


def _gelu(x):
    return 0.5 * x * (1.0 + jnp.tanh(0.7978845608028654 * (x + 0.044715 * x * x * x)))


# ----------------------------------------------------------------------------
# per-generation tuning (VMEM limit, VMASK token-tile size)
# ----------------------------------------------------------------------------
def _tpu_generation_defaults():
    try:
        cap = int(pltpu.get_tpu_info().vmem_capacity_bytes)
    except Exception:
        cap = 0
    if cap > 0:
        vmem_limit = min(96 * 1024 * 1024, (cap * 3) // 4)   # ~96 MiB v5e/v6e, ~48 MiB v7x
        tm = 1024 if cap >= 100 * 1024 * 1024 else 512
    else:
        vmem_limit = 32 * 1024 * 1024
        tm = 512
    return vmem_limit, tm


_VMEM_LIMIT, _TM_DEFAULT = _tpu_generation_defaults()


def _pick_tq(S):
    """Query-tile size for the encoder grid: divides S, multiple of 8 (or == S)."""
    if S <= 512:
        return S
    for t in (512, 384, 256, 128, 64):
        if S % t == 0:
            return t
    return S


# ----------------------------------------------------------------------------
# fused embeddings-LayerNorm + VMASK kernel
# ----------------------------------------------------------------------------
def ln_vmask_kernel(train, n_valid, tm,
                    emb_ref, g_ref, b_ref, w1_ref, b1_ref, w2_ref, b2_ref,
                    *rest):
    """Fused embeddings-LayerNorm + VMASK (mask + per-tile infor_loss partial)."""
    if train:
        gn_ref, xp_ref, p_ref, il_ref = rest
    else:
        xp_ref, p_ref, il_ref = rest

    # LayerNorm of the embeddings for this token tile (f32 math).
    x = _ln(emb_ref[...], g_ref[...], b_ref[...])                   # [TM, H]

    # VMASK MLP: p = (tanh(x @ W1 + b1)) @ W2 + b2   (bf16 MXU, f32 accum)
    xb = x.astype(jnp.bfloat16)
    h = jnp.tanh(jnp.dot(xb, w1_ref[...],
                         preferred_element_type=jnp.float32) + b1_ref[...])
    p = jnp.dot(h.astype(jnp.bfloat16), w2_ref[...],
                preferred_element_type=jnp.float32) + b2_ref[...]   # [TM, 2]
    # TODO(synk): emit p lane-dense ([2, N] layout) to avoid the masked
    #             2-lane store path.
    p_ref[...] = p

    p0 = p[:, 0:1]
    p1 = p[:, 1:2]
    # 2-class softmax probability of class 1 == sigmoid(p1 - p0)
    prob1 = 1.0 / (1.0 + jnp.exp(p0 - p1))
    prob0 = 1.0 - prob1

    if train:
        # hard gumbel-softmax forward value: one-hot of argmax(p + g), class 1
        g = gn_ref[...]
        r = (p1 + g[:, 1:2] > p0 + g[:, 0:1]).astype(jnp.float32)
        xp_ref[...] = (r * x).astype(xp_ref.dtype)
    else:
        xp_ref[...] = (prob1 * x).astype(xp_ref.dtype)

    # per-tile infor_loss partial over valid rows (reduced in JAX afterwards;
    # keeps the token-tile grid axis fully parallel).
    rows = pl.program_id(0) * tm + jax.lax.broadcasted_iota(
        jnp.int32, (tm, 1), 0)
    valid = (rows < n_valid).astype(jnp.float32)
    il = valid * (prob1 * jnp.log(prob1 + 1e-8)
                  + prob0 * jnp.log(prob0 + 1e-8))                  # [TM, 1]
    il_ref[0] = jnp.sum(il, axis=0, keepdims=True)                  # (1, 1)


def embed_ln_vmask(emb_flat, params, train, gnoise=None):
    """Fused LayerNorm + VMASK over [N, H] token rows, gridded over tiles."""
    N, H = emb_flat.shape
    TM = min(_TM_DEFAULT, _round_up(N, 8))
    Np = _round_up(N, TM)
    if Np != N:
        emb_flat = jnp.pad(emb_flat, ((0, Np - N), (0, 0)))
        if gnoise is not None:
            gnoise = jnp.pad(gnoise, ((0, Np - N), (0, 0)))
    nt = Np // TM
    Hm = params["vm_w1"].shape[1]

    in_specs = [
        pl.BlockSpec((TM, H), lambda i: (i, 0)),      # emb tile
        pl.BlockSpec((1, H), lambda i: (0, 0)),       # ln gamma
        pl.BlockSpec((1, H), lambda i: (0, 0)),       # ln beta
        pl.BlockSpec((H, Hm), lambda i: (0, 0)),      # vm_w1 (bf16)
        pl.BlockSpec((1, Hm), lambda i: (0, 0)),      # vm_b1
        pl.BlockSpec((Hm, 2), lambda i: (0, 0)),      # vm_w2 (bf16)
        pl.BlockSpec((1, 2), lambda i: (0, 0)),       # vm_b2
    ]
    args = [emb_flat, params["emb_ln_g"], params["emb_ln_b"],
            params["vm_w1"], params["vm_b1"], params["vm_w2"], params["vm_b2"]]
    if train:
        in_specs.append(pl.BlockSpec((TM, 2), lambda i: (i, 0)))
        args.append(gnoise)

    out_specs = (pl.BlockSpec((TM, H), lambda i: (i, 0)),
                 pl.BlockSpec((TM, 2), lambda i: (i, 0)),
                 pl.BlockSpec((1, 1, 1), lambda i: (i, 0, 0)))
    out_shape = (jax.ShapeDtypeStruct((Np, H), jnp.bfloat16),     # bf16 activations
                 jax.ShapeDtypeStruct((Np, 2), jnp.float32),
                 jax.ShapeDtypeStruct((nt, 1, 1), jnp.float32))

    xp, p, il_parts = pl.pallas_call(
        functools.partial(ln_vmask_kernel, train, N, TM),
        grid=(nt,),
        in_specs=in_specs,
        out_specs=out_specs,
        out_shape=out_shape,
        compiler_params=pltpu.CompilerParams(
            dimension_semantics=("parallel",),
            vmem_limit_bytes=_VMEM_LIMIT),
    )(*args)

    return xp[:N], p[:N], jnp.sum(il_parts) / N


# ----------------------------------------------------------------------------
# full BERT encoder stack: ONE pallas_call, grid = (layer, batch, q_tile)
# ----------------------------------------------------------------------------
_LAYER_KEYS = ("wqkv", "bqkv", "wo", "bo", "ln1g", "ln1b",
               "wf1", "bf1", "wf2", "bf2", "ln2g", "ln2b")


def encoder_kernel(x_ref, am_ref,
                   wqkv_ref, bqkv_ref, wo_ref, bo_ref,
                   ln1g_ref, ln1b_ref, wf1_ref, bf1_ref, wf2_ref, bf2_ref,
                   ln2g_ref, ln2b_ref,
                   o_ref,
                   xs_ref, qkv_ref, ctx_ref,
                   *, num_heads, tq):
    l = pl.program_id(0)
    b = pl.program_id(1)
    qi = pl.program_id(2)

    S = x_ref.shape[1]
    H = x_ref.shape[2]
    dh = H // num_heads
    scale = 1.0 / float(dh) ** 0.5

    # Layer-0 init: copy this batch element's VMASK'ed embeddings into the
    # resident activation scratch (activations never round-trip HBM between
    # layers of the stack).
    @pl.when((l == 0) & (qi == 0))
    def _():
        xs_ref[b] = x_ref[0]

    # Once per (layer, batch): fused QKV projection for the full sequence
    # (one MXU launch with N=3H, bf16 operands, f32 accumulation).
    @pl.when(qi == 0)
    def _():
        xin = xs_ref[b]                                             # (S, H) bf16
        qkv = jnp.dot(xin, wqkv_ref[0],
                      preferred_element_type=jnp.float32) + bqkv_ref[0]
        qkv_ref[...] = qkv.astype(jnp.bfloat16)                     # (S, 3H)

    row0 = qi * tq
    if tq % 8 == 0:
        row0 = pl.multiple_of(row0, 8)

    am = am_ref[0]                                                  # (1, S) f32
    qrows = qkv_ref[pl.ds(row0, tq), :]                             # (tq, 3H) bf16

    # Per-head attention; each head's context is written to the [tq, H] scratch
    # at its static lane offset so the output projection runs once with K=H.
    # TODO(synk): lax.fori_loop(unroll=2) + pl.ds head slices for large head
    #             counts (static unroll kept for lowering robustness at small dh).
    for hi in range(num_heads):
        c0 = hi * dh
        qh = qrows[:, c0:c0 + dh]                                   # (tq, dh) bf16
        kh = qkv_ref[:, H + c0:H + c0 + dh]                         # (S, dh) bf16
        vh = qkv_ref[:, 2 * H + c0:2 * H + c0 + dh]                 # (S, dh) bf16
        scores = jax.lax.dot_general(
            qh, kh, (((1,), (1,)), ((), ())),
            preferred_element_type=jnp.float32) * scale + am        # (tq, S) f32
        mx = jnp.max(scores, axis=-1, keepdims=True)
        e = jnp.exp(scores - mx)
        attn = e * pl.reciprocal(jnp.sum(e, axis=-1, keepdims=True), approx=True)
        ctx = jnp.dot(attn.astype(jnp.bfloat16), vh,
                      preferred_element_type=jnp.float32)           # (tq, dh)
        ctx_ref[:, c0:c0 + dh] = ctx.astype(jnp.bfloat16)

    # single output projection with full contraction depth K=H
    attn_out = jnp.dot(ctx_ref[...], wo_ref[0],
                       preferred_element_type=jnp.float32) + bo_ref[0]   # (tq, H)

    x_tile = xs_ref[b, pl.ds(row0, tq), :].astype(jnp.float32)
    h1 = _ln(x_tile + attn_out, ln1g_ref[0], ln1b_ref[0])

    # TODO(synk): tile the FFN over F (emit_pipeline) for large F on v7x.
    ff = jnp.dot(h1.astype(jnp.bfloat16), wf1_ref[0],
                 preferred_element_type=jnp.float32) + bf1_ref[0]
    ff = _gelu(ff)
    ff = jnp.dot(ff.astype(jnp.bfloat16), wf2_ref[0],
                 preferred_element_type=jnp.float32) + bf2_ref[0]
    out = _ln(h1 + ff, ln2g_ref[0], ln2b_ref[0]).astype(jnp.bfloat16)

    o_ref[0] = out
    # This tile's output becomes the next layer's input (written AFTER the
    # residual read of the same rows above).
    xs_ref[b, pl.ds(row0, tq), :] = out


def bert_encoder(x, amask, layers, *, num_heads):
    """x: [B, S, H] bf16 VMASK'ed embeddings; returns [B, S, H] bf16."""
    B, S, H = x.shape
    L = layers["wqkv"].shape[0]
    TQ = _pick_tq(S)
    nq = S // TQ

    def wspec(arr):
        blk = (1,) + arr.shape[1:]
        return pl.BlockSpec(blk, lambda l, b, q: (l, 0, 0))

    in_specs = ([pl.BlockSpec((1, S, H), lambda l, b, q: (b, 0, 0)),
                 pl.BlockSpec((1, 1, S), lambda l, b, q: (b, 0, 0))]
                + [wspec(layers[k]) for k in _LAYER_KEYS])
    out_spec = pl.BlockSpec((1, TQ, H), lambda l, b, q: (b, q, 0))

    # TODO(synk): on v7x mark a leading batch axis "parallel" for megacore;
    #             kept all-"arbitrary" here because the layer axis must stay
    #             sequential and leading (weight-prefetch overlap).
    return pl.pallas_call(
        functools.partial(encoder_kernel, num_heads=num_heads, tq=TQ),
        grid=(L, B, nq),
        in_specs=in_specs,
        out_specs=out_spec,
        out_shape=jax.ShapeDtypeStruct((B, S, H), jnp.bfloat16),
        scratch_shapes=[
            pltpu.VMEM((B, S, H), jnp.bfloat16),    # resident layer activations
            pltpu.VMEM((S, 3 * H), jnp.bfloat16),   # fused QKV for current (l, b)
            pltpu.VMEM((TQ, H), jnp.bfloat16),      # per-tile head contexts
        ],
        compiler_params=pltpu.CompilerParams(
            dimension_semantics=("arbitrary", "arbitrary", "arbitrary"),
            vmem_limit_bytes=_VMEM_LIMIT),
    )(x, amask, *[layers[k] for k in _LAYER_KEYS])


# ----------------------------------------------------------------------------
# full forward pass
# ----------------------------------------------------------------------------
def mask_bert_forward(params, cfg, inputs, flag="eval", rng=None):
    input_ids = inputs["input_ids"]
    token_type_ids = inputs["token_type_ids"]
    attention_mask = inputs["attention_mask"]
    labels = inputs["labels"]

    B, S = input_ids.shape
    H = cfg["hidden"]

    # ---- BERT embeddings (table gathers are plain-JAX glue) ----
    emb = (params["word_emb"][input_ids]
           + params["type_emb"][token_type_ids]
           + params["pos_emb"][None, :S, :])
    emb_flat = emb.reshape(B * S, H).astype(jnp.float32)

    # ---- fused embeddings-LayerNorm + VMASK (mask, p, infor_loss) ----
    train = (flag == "train")
    gnoise = None
    if train:
        assert rng is not None
        gnoise = jax.random.gumbel(rng, (B * S, 2), jnp.float32)
    xprime_flat, p_flat, infor_loss = embed_ln_vmask(
        emb_flat, params, train, gnoise)

    x = xprime_flat.reshape(B, S, H)                                 # bf16

    # ---- BERT encoder (single pallas_call over all layers) ----
    amask = ((1.0 - attention_mask.astype(jnp.float32)) * -10000.0).reshape(B, 1, S)
    x = bert_encoder(x, amask, params["layers"], num_heads=cfg["num_heads"])

    # ---- pooler + classifier + cross-entropy (plain JAX per perf review:
    #      tiny [B,H] matmuls, a separate kernel only adds launch overhead) ----
    h_cls = x[:, 0, :]                                               # bf16 [B, H]
    pooled = jnp.tanh(jnp.dot(h_cls, params["pool_w"],
                              preferred_element_type=jnp.float32) + params["pool_b"])
    logits = jnp.dot(pooled.astype(jnp.bfloat16), params["cls_w"],
                     preferred_element_type=jnp.float32) + params["cls_b"]
    logp = jax.nn.log_softmax(logits, axis=-1)
    loss = -jnp.mean(jnp.take_along_axis(logp, labels[:, None].astype(jnp.int32),
                                         axis=-1))

    return loss, logits, infor_loss, p_flat.reshape(B, S, 2)


# ----------------------------------------------------------------------------
# deterministic parameter init (matmul weights bf16, biases/LN f32,
# encoder-layer weights stacked along a leading [L] axis, QKV fused)
# ----------------------------------------------------------------------------
def init_params(key, cfg):
    H, F, Hm, L = cfg["hidden"], cfg["ffn"], cfg["mask_hidden_dim"], cfg["num_layers"]

    def nrm(k, shape, scale=0.02, dtype=jnp.float32):
        return (scale * jax.random.normal(k, shape, jnp.float32)).astype(dtype)

    bf = jnp.bfloat16
    keys = iter(jax.random.split(key, 64))
    params = {
        "word_emb": nrm(next(keys), (cfg["vocab"], H)),
        "type_emb": nrm(next(keys), (cfg["type_vocab"], H)),
        "pos_emb":  nrm(next(keys), (cfg["max_pos"], H)),
        "emb_ln_g": jnp.ones((1, H), jnp.float32),
        "emb_ln_b": jnp.zeros((1, H), jnp.float32),
        # VMASK
        "vm_w1": nrm(next(keys), (H, Hm), 0.1, bf),
        "vm_b1": jnp.zeros((1, Hm), jnp.float32),
        "vm_w2": nrm(next(keys), (Hm, 2), 0.1, bf),
        "vm_b2": jnp.zeros((1, 2), jnp.float32),
        # pooler / classifier
        "pool_w": nrm(next(keys), (H, H), dtype=bf),
        "pool_b": jnp.zeros((1, H), jnp.float32),
        "cls_w":  nrm(next(keys), (H, cfg["num_labels"]), dtype=bf),
        "cls_b":  jnp.zeros((1, cfg["num_labels"]), jnp.float32),
        # encoder layers, stacked [L, ...] with fused QKV
        "layers": {
            "wqkv": nrm(next(keys), (L, H, 3 * H), dtype=bf),
            "bqkv": jnp.zeros((L, 1, 3 * H), jnp.float32),
            "wo":   nrm(next(keys), (L, H, H), dtype=bf),
            "bo":   jnp.zeros((L, 1, H), jnp.float32),
            "ln1g": jnp.ones((L, 1, H), jnp.float32),
            "ln1b": jnp.zeros((L, 1, H), jnp.float32),
            "wf1":  nrm(next(keys), (L, H, F), dtype=bf),
            "bf1":  jnp.zeros((L, 1, F), jnp.float32),
            "wf2":  nrm(next(keys), (L, F, H), dtype=bf),
            "bf2":  jnp.zeros((L, 1, H), jnp.float32),
            "ln2g": jnp.ones((L, 1, H), jnp.float32),
            "ln2b": jnp.zeros((L, 1, H), jnp.float32),
        },
    }
    return params


# ----------------------------------------------------------------------------
# main
# ----------------------------------------------------------------------------
if __name__ == "__main__":
    cfg = dict(vocab=50, type_vocab=2, max_pos=32,
               hidden=32, num_heads=2, ffn=64, num_layers=2,
               mask_hidden_dim=16, num_labels=2)
    B, S = 2, 8

    root = jax.random.PRNGKey(0)
    kp, ki, kl = jax.random.split(root, 3)
    params = init_params(kp, cfg)

    input_ids = jax.random.randint(ki, (B, S), 0, cfg["vocab"], jnp.int32)
    token_type_ids = jnp.zeros((B, S), jnp.int32)
    attention_mask = jnp.ones((B, S), jnp.int32).at[1, 6:].set(0)
    labels = jax.random.randint(kl, (B,), 0, cfg["num_labels"], jnp.int32)

    inputs = dict(input_ids=input_ids, token_type_ids=token_type_ids,
                  attention_mask=attention_mask, labels=labels)

    loss, logits, infor_loss, p = mask_bert_forward(params, cfg, inputs, flag="eval")
    jax.block_until_ready((loss, logits, infor_loss, p))
    print("KERNEL_OK")
</pallas_src>

<mosaic_0001>
module attributes {stable_mosaic.version = 11 : i64} {
  func.func @ln_vmask_kernel(%arg0: i32, %arg1: memref<16x32xf32, #tpu.memory_space<vmem>>, %arg2: memref<1x32xf32, #tpu.memory_space<vmem>>, %arg3: memref<1x32xf32, #tpu.memory_space<vmem>>, %arg4: memref<32x16xbf16, #tpu.memory_space<vmem>>, %arg5: memref<1x16xf32, #tpu.memory_space<vmem>>, %arg6: memref<16x2xbf16, #tpu.memory_space<vmem>>, %arg7: memref<1x2xf32, #tpu.memory_space<vmem>>, %arg8: memref<16x32xbf16, #tpu.memory_space<vmem>>, %arg9: memref<16x2xf32, #tpu.memory_space<vmem>>, %arg10: memref<1x1x1xf32, #tpu.memory_space<vmem>>) attributes {dimension_semantics = [#tpu.dimension_semantics<parallel>], iteration_bounds = array<i64: 1>, scalar_prefetch = 0 : i64, scratch_operands = 0 : i64, tpu.core_type = #tpu.core_type<tc>, window_params = [{transform_indices = @transform_0, window_bounds = array<i64: 16, 32>}, {pipeline_mode = #tpu.pipeline_mode<synchronous>, transform_indices = @transform_1, window_bounds = array<i64: 1, 32>}, {pipeline_mode = #tpu.pipeline_mode<synchronous>, transform_indices = @transform_2, window_bounds = array<i64: 1, 32>}, {pipeline_mode = #tpu.pipeline_mode<synchronous>, transform_indices = @transform_3, window_bounds = array<i64: 32, 16>}, {pipeline_mode = #tpu.pipeline_mode<synchronous>, transform_indices = @transform_4, window_bounds = array<i64: 1, 16>}, {pipeline_mode = #tpu.pipeline_mode<synchronous>, transform_indices = @transform_5, window_bounds = array<i64: 16, 2>}, {pipeline_mode = #tpu.pipeline_mode<synchronous>, transform_indices = @transform_6, window_bounds = array<i64: 1, 2>}, {transform_indices = @transform_7, window_bounds = array<i64: 16, 32>}, {transform_indices = @transform_8, window_bounds = array<i64: 16, 2>}, {transform_indices = @transform_9, window_bounds = array<i64: 1, 1, 1>}]} {
    %c0 = arith.constant 0 : index
    %c0_0 = arith.constant 0 : index
    %0 = vector.load %arg1[%c0, %c0_0] : memref<16x32xf32, #tpu.memory_space<vmem>>, vector<16x32xf32>
    %c0_1 = arith.constant 0 : index
    %c0_2 = arith.constant 0 : index
    %1 = vector.load %arg2[%c0_1, %c0_2] : memref<1x32xf32, #tpu.memory_space<vmem>>, vector<1x32xf32>
    %c0_3 = arith.constant 0 : index
    %c0_4 = arith.constant 0 : index
    %2 = vector.load %arg3[%c0_3, %c0_4] : memref<1x32xf32, #tpu.memory_space<vmem>>, vector<1x32xf32>
    %cst = arith.constant dense<0.000000e+00> : vector<16xf32>
    %3 = vector.multi_reduction <add>, %0, %cst [1] : vector<16x32xf32> to vector<16xf32>
    %4 = vector.shape_cast %3 : vector<16xf32> to vector<16x1xf32>
    %cst_5 = arith.constant 3.200000e+01 : f32
    %5 = vector.broadcast %cst_5 : f32 to vector<16x1xf32>
    %6 = arith.divf %4, %5 : vector<16x1xf32>
    %7 = vector.broadcast %6 : vector<16x1xf32> to vector<16x32xf32>
    %8 = arith.subf %0, %7 : vector<16x32xf32>
    %9 = arith.mulf %8, %8 : vector<16x32xf32>
    %cst_6 = arith.constant dense<0.000000e+00> : vector<16xf32>
    %10 = vector.multi_reduction <add>, %9, %cst_6 [1] : vector<16x32xf32> to vector<16xf32>
    %11 = vector.shape_cast %10 : vector<16xf32> to vector<16x1xf32>
    %cst_7 = arith.constant 3.200000e+01 : f32
    %12 = vector.broadcast %cst_7 : f32 to vector<16x1xf32>
    %13 = arith.divf %11, %12 : vector<16x1xf32>
    %14 = vector.broadcast %6 : vector<16x1xf32> to vector<16x32xf32>
    %15 = arith.subf %0, %14 : vector<16x32xf32>
    %cst_8 = arith.constant 9.99999996E-13 : f32
    %16 = vector.broadcast %cst_8 : f32 to vector<16x1xf32>
    %17 = arith.addf %13, %16 : vector<16x1xf32>
    %18 = math.rsqrt %17 : vector<16x1xf32>
    %19 = vector.broadcast %18 : vector<16x1xf32> to vector<16x32xf32>
    %20 = arith.mulf %15, %19 : vector<16x32xf32>
    %21 = vector.broadcast %1 : vector<1x32xf32> to vector<16x32xf32>
    %22 = arith.mulf %20, %21 : vector<16x32xf32>
    %23 = vector.broadcast %2 : vector<1x32xf32> to vector<16x32xf32>
    %24 = arith.addf %22, %23 : vector<16x32xf32>
    %25 = arith.truncf %24 : vector<16x32xf32> to vector<16x32xbf16>
    %c0_9 = arith.constant 0 : index
    %c0_10 = arith.constant 0 : index
    %26 = vector.load %arg4[%c0_9, %c0_10] : memref<32x16xbf16, #tpu.memory_space<vmem>>, vector<32x16xbf16>
    %cst_11 = arith.constant dense<0.000000e+00> : vector<16x16xf32>
    %27 = tpu.matmul %25, %26, %cst_11 {dimension_numbers = #tpu.dot_dimension_numbers<[1], [0], [0], [1], [0, 0, 1, 1], [], []>} : vector<16x32xbf16>, vector<32x16xbf16>, vector<16x16xf32> -> vector<16x16xf32>
    %c0_12 = arith.constant 0 : index
    %c0_13 = arith.constant 0 : index
    %28 = vector.load %arg5[%c0_12, %c0_13] : memref<1x16xf32, #tpu.memory_space<vmem>>, vector<1x16xf32>
    %29 = vector.broadcast %28 : vector<1x16xf32> to vector<16x16xf32>
    %30 = arith.addf %27, %29 : vector<16x16xf32>
    %31 = math.tanh %30 : vector<16x16xf32>
    %32 = arith.truncf %31 : vector<16x16xf32> to vector<16x16xbf16>
    %c0_14 = arith.constant 0 : index
    %c0_15 = arith.constant 0 : index
    %33 = vector.load %arg6[%c0_14, %c0_15] : memref<16x2xbf16, #tpu.memory_space<vmem>>, vector<16x2xbf16>
    %cst_16 = arith.constant dense<0.000000e+00> : vector<16x2xf32>
    %34 = tpu.matmul %32, %33, %cst_16 {dimension_numbers = #tpu.dot_dimension_numbers<[1], [0], [0], [1], [0, 0, 1, 1], [], []>} : vector<16x16xbf16>, vector<16x2xbf16>, vector<16x2xf32> -> vector<16x2xf32>
    %c0_17 = arith.constant 0 : index
    %c0_18 = arith.constant 0 : index
    %35 = vector.load %arg7[%c0_17, %c0_18] : memref<1x2xf32, #tpu.memory_space<vmem>>, vector<1x2xf32>
    %36 = vector.broadcast %35 : vector<1x2xf32> to vector<16x2xf32>
    %37 = arith.addf %34, %36 : vector<16x2xf32>
    %c0_19 = arith.constant 0 : index
    %c0_20 = arith.constant 0 : index
    %38 = vector.load %arg9[%c0_19, %c0_20] : memref<16x2xf32, #tpu.memory_space<vmem>>, vector<16x2xf32>
    tpu.vector_store %arg9[%c0_19, %c0_20], %37 {strides = array<i32>} : memref<16x2xf32, #tpu.memory_space<vmem>>, vector<16x2xf32>,
    %39 = vector.extract_strided_slice %37 {offsets = [0, 0], sizes = [16, 1], strides = [1, 1]} : vector<16x2xf32> to vector<16x1xf32>
    %40 = vector.extract_strided_slice %37 {offsets = [0, 1], sizes = [16, 1], strides = [1, 1]} : vector<16x2xf32> to vector<16x1xf32>
    %41 = arith.subf %39, %40 : vector<16x1xf32>
    %42 = math.exp %41 : vector<16x1xf32>
    %cst_21 = arith.constant 1.000000e+00 : f32
    %43 = vector.broadcast %cst_21 : f32 to vector<16x1xf32>
    %44 = arith.addf %43, %42 : vector<16x1xf32>
    %cst_22 = arith.constant 1.000000e+00 : f32
    %45 = vector.broadcast %cst_22 : f32 to vector<16x1xf32>
    %46 = arith.divf %45, %44 : vector<16x1xf32>
    %cst_23 = arith.constant 1.000000e+00 : f32
    %47 = vector.broadcast %cst_23 : f32 to vector<16x1xf32>
    %48 = arith.subf %47, %46 : vector<16x1xf32>
    %49 = vector.broadcast %46 : vector<16x1xf32> to vector<16x32xf32>
    %50 = arith.mulf %49, %24 : vector<16x32xf32>
    %51 = arith.truncf %50 : vector<16x32xf32> to vector<16x32xbf16>
    %c0_24 = arith.constant 0 : index
    %c0_25 = arith.constant 0 : index
    %52 = vector.load %arg8[%c0_24, %c0_25] : memref<16x32xbf16, #tpu.memory_space<vmem>>, vector<16x32xbf16>
    tpu.vector_store %arg8[%c0_24, %c0_25], %51 {strides = array<i32>} : memref<16x32xbf16, #tpu.memory_space<vmem>>, vector<16x32xbf16>,
    %c16_i32 = arith.constant 16 : i32
    %53 = arith.muli %arg0, %c16_i32 : i32
    %54 = tpu.iota {dimensions = array<i32: 0>} : vector<16x1xi32>
    %55 = vector.broadcast %53 : i32 to vector<16x1xi32>
    %56 = arith.addi %55, %54 : vector<16x1xi32>
    %c16_i32_26 = arith.constant 16 : i32
    %57 = vector.broadcast %c16_i32_26 : i32 to vector<16x1xi32>
    %58 = arith.cmpi slt, %56, %57 : vector<16x1xi32>
    %59 = arith.extui %58 : vector<16x1xi1> to vector<16x1xi32>
    %60 = arith.sitofp %59 : vector<16x1xi32> to vector<16x1xf32>
    %cst_27 = arith.constant 9.99999993E-9 : f32
    %61 = vector.broadcast %cst_27 : f32 to vector<16x1xf32>
    %62 = arith.addf %46, %61 : vector<16x1xf32>
    %63 = math.log %62 : vector<16x1xf32>
    %64 = arith.mulf %46, %63 : vector<16x1xf32>
    %cst_28 = arith.constant 9.99999993E-9 : f32
    %65 = vector.broadcast %cst_28 : f32 to vector<16x1xf32>
    %66 = arith.addf %48, %65 : vector<16x1xf32>
    %67 = math.log %66 : vector<16x1xf32>
    %68 = arith.mulf %48, %67 : vector<16x1xf32>
    %69 = arith.addf %64, %68 : vector<16x1xf32>
    %70 = arith.mulf %60, %69 : vector<16x1xf32>
    %cst_29 = arith.constant dense<0.000000e+00> : vector<1xf32>
    %71 = vector.multi_reduction <add>, %70, %cst_29 [0] : vector<16x1xf32> to vector<1xf32>
    %72 = vector.shape_cast %71 : vector<1xf32> to vector<1x1xf32>
    %c0_30 = arith.constant 0 : index
    %c0_31 = arith.constant 0 : index
    %c0_32 = arith.constant 0 : index
    %73 = vector.load %arg10[%c0_30, %c0_31, %c0_32] : memref<1x1x1xf32, #tpu.memory_space<vmem>>, vector<1x1x1xf32>
    %74 = vector.shape_cast %73 : vector<1x1x1xf32> to vector<1x1xf32>
    %75 = vector.shape_cast %72 : vector<1x1xf32> to vector<1x1x1xf32>
    tpu.vector_store %arg10[%c0_30, %c0_31, %c0_32], %75 {strides = array<i32>} : memref<1x1x1xf32, #tpu.memory_space<vmem>>, vector<1x1x1xf32>,
    return
  }
  func.func @transform_0(%arg0: i32) -> (i32, i32) {
    %c0_i32 = arith.constant 0 : i32
    %c0_i32_0 = arith.constant 0 : i32
    return %arg0, %c0_i32 : i32, i32
  }
  func.func @transform_1(%arg0: i32) -> (i32, i32) {
    %c0_i32 = arith.constant 0 : i32
    %c0_i32_0 = arith.constant 0 : i32
    %c0_i32_1 = arith.constant 0 : i32
    return %c0_i32, %c0_i32_0 : i32, i32
  }
  func.func @transform_2(%arg0: i32) -> (i32, i32) {
    %c0_i32 = arith.constant 0 : i32
    %c0_i32_0 = arith.constant 0 : i32
    %c0_i32_1 = arith.constant 0 : i32
    return %c0_i32, %c0_i32_0 : i32, i32
  }
  func.func @transform_3(%arg0: i32) -> (i32, i32) {
    %c0_i32 = arith.constant 0 : i32
    %c0_i32_0 = arith.constant 0 : i32
    %c0_i32_1 = arith.constant 0 : i32
    return %c0_i32, %c0_i32_0 : i32, i32
  }
  func.func @transform_4(%arg0: i32) -> (i32, i32) {
    %c0_i32 = arith.constant 0 : i32
    %c0_i32_0 = arith.constant 0 : i32
    %c0_i32_1 = arith.constant 0 : i32
    return %c0_i32, %c0_i32_0 : i32, i32
  }
  func.func @transform_5(%arg0: i32) -> (i32, i32) {
    %c0_i32 = arith.constant 0 : i32
    %c0_i32_0 = arith.constant 0 : i32
    %c0_i32_1 = arith.constant 0 : i32
    return %c0_i32, %c0_i32_0 : i32, i32
  }
  func.func @transform_6(%arg0: i32) -> (i32, i32) {
    %c0_i32 = arith.constant 0 : i32
    %c0_i32_0 = arith.constant 0 : i32
    %c0_i32_1 = arith.constant 0 : i32
    return %c0_i32, %c0_i32_0 : i32, i32
  }
  func.func @transform_7(%arg0: i32) -> (i32, i32) {
    %c0_i32 = arith.constant 0 : i32
    %c0_i32_0 = arith.constant 0 : i32
    return %arg0, %c0_i32 : i32, i32
  }
  func.func @transform_8(%arg0: i32) -> (i32, i32) {
    %c0_i32 = arith.constant 0 : i32
    %c0_i32_0 = arith.constant 0 : i32
    return %arg0, %c0_i32 : i32, i32
  }
  func.func @transform_9(%arg0: i32) -> (i32, i32, i32) {
    %c0_i32 = arith.constant 0 : i32
    %c0_i32_0 = arith.constant 0 : i32
    %c0_i32_1 = arith.constant 0 : i32
    return %arg0, %c0_i32, %c0_i32_0 : i32, i32, i32
  }
}

</mosaic_0001>

<bundles_post_ra>
// kernel: tpu_custom_call.1
= control target key start
LH: loop header
LB: loop body
LE: loop exit
PB: predicated region body
PF: predicated region fallthrough
CT: control target
= control target key end

     0   :  { %15 = vsyncpa [#allocation3], 0  ;;  %vm36_vm0 = vcmask 261120   ;;  %s583_s0 = inlined_call_operand.vmem [shape: f32[16,32], index: 0, kind: input, shape index: {}]   ;;  %s584_s1 = inlined_call_operand.vmem [shape: f32[1,32], index: 1, kind: input, shape index: {}]   ;;  %s585_s2 = inlined_call_operand.vmem [shape: f32[1,32], index: 2, kind: input, shape index: {}]   ;;  %s586_s3 = inlined_call_operand.vmem [shape: bf16[32,16], index: 3, kind: input, shape index: {}]   ;;  %s587_s4 = inlined_call_operand.vmem [shape: f32[1,16], index: 4, kind: input, shape index: {}]   ;;  %s588_s5 = inlined_call_operand.vmem [shape: bf16[16,2], index: 5, kind: input, shape index: {}]   ;;  %s589_s6 = inlined_call_operand.vmem [shape: f32[1,2], index: 6, kind: input, shape index: {}]   ;;  %s590_s7 = inlined_call_operand.hbm [shape: bf16[16,32], index: 7, kind: output, shape index: {0}]   ;;  %s591_s8 = inlined_call_operand.vmem [shape: f32[16,2], index: 8, kind: output, shape index: {1}]   ;;  %s592_s9 = inlined_call_operand.hbm [shape: f32[1,1,1], index: 9, kind: output, shape index: {2}]  }
   0x1   :  { %v32_v0 = vld [vmem:[%s583_s0] sm:$0xff]  ;;  %v33_v1 = vld [vmem:[%s583_s0 + $0x8] sm:$0xff] }
   0x2   :  { %v37_v2 = vsel %vm36_vm0, %v32_v0, 0.0  ;;  %v40_v3 = vsel %vm36_vm0, %v33_v1, 0.0 }
   0x3   :  { %38 = vadd.xlane.f32.xlu0 %v37_v2 }
   0x4   :  { %16 = vsyncpa [#allocation5], 0  ;;  %v380_v14 = vld [vmem:[%s586_s3] sm:$0xff]   ;;  %v455_v15 = vmov 0.0   ;;  %v381_v16 = vld [vmem:[%s586_s3 + $0x8] sm:$0xff]   ;;  %vm456_vm1 = vmmov 0  }
   0x5   :  { %356 = vmatprep.subr.bf16.mxu0 %v455_v15  ;;  %364 = vmatprep.subr.bf16.mxu1 %v455_v15  ;;  %v338_v25 = vld [vmem:[%s584_s1] ss:$0 sm:$0xff]  ;;  %vm166_vm2 = vcmask 130048   ;;  %vm211_vm3 = vcmask 15360   ;;  %s457_s23 = smov 127   ;;  %v458_v52 = vmov 0  }
   0x6   :  { %357 = vmatpush3.bf16.msra.mxu0 %v380_v14  ;;  %360 = vmatprep.mubr.msk.bf16.mxu0 %vm456_vm1, %v455_v15  ;;  %v339_v29 = vld [vmem:[%s585_s2] ss:$0 sm:$0xff]  ;;  %vm292_vm4 = vcmask 7168   ;;  %vm302_vm5 = vcmask 0  }
   0x7   :  { %41 = vadd.xlane.f32.xlu0 %v40_v3  ;;  %358 = vmatprep.subr.bf16.mxu0 %v455_v15  ;;  %v382_v34 = vld [vmem:[%s588_s5] sm:$0xff]  }
   0x8   :  { %366 = vmatprep.mubr.msk.bf16.mxu1 %vm456_vm1, %v455_v15  ;;  %365 = vmatpush3.bf16.msra.mxu1 %v382_v34  ;;  %v340_v35 = vld [vmem:[%s587_s4] ss:$0 sm:$0xff] }
   0x9   :  { %v344_v45 = vld [vmem:[%s589_s6] ss:$0 sm:$0xff]  ;;  %378 = vset.pattern.permute.xlu1 %v458_v52  ;;  %379 = vset.pattern.permute.xlu0 %v458_v52  ;;  %s459_s6 = smov [#allocation4]  }
   0xa   :  { %359 = vmatpush3.bf16.msra.mxu0 %v381_v16 }
  0x90   :  { %v39_v4 = vpop.xlane.xlu0 %38 }
  0x91   :  { %v44_v5 = vmul.f32 0.03125, %v39_v4 }
  0x93   :  { %v46_v6 = vsub.f32 %v32_v0, %v44_v5 }
  0x94   :  { %v42_v7 = vpop.xlane.xlu0 %41 }
  0x95   :  { %v45_v8 = vmul.f32 0.03125, %v42_v7  ;;  %v48_v9 = vmul.f32 %v46_v6, %v46_v6 }
  0x97   :  { %v47_v10 = vsub.f32 %v33_v1, %v45_v8  ;;  %v50_v11 = vsel %vm36_vm0, %v48_v9, 0.0 }
  0x98   :  { %51 = vadd.xlane.f32.xlu1 %v50_v11 }
  0x99   :  { %v49_v12 = vmul.f32 %v47_v10, %v47_v10 }
  0x9b   :  { %v53_v13 = vsel %vm36_vm0, %v49_v12, 0.0 }
  0x9c   :  { %54 = vadd.xlane.f32.xlu1 %v53_v13 }
 0x125   :  { %v52_v17 = vpop.xlane.xlu1 %51 }
 0x126   :  { %v56_v18 = vmul.f32 0.03125, %v52_v17 }
 0x128   :  { %v58_v19 = vadd.f32 1e-12, %v56_v18 }
 0x129   :  { %v55_v20 = vpop.xlane.xlu1 %54 }
 0x12a   :  { %383 = vrsqrt.f32 %v58_v19  ;;  %v57_v21 = vmul.f32 0.03125, %v55_v20 }
 0x12c   :  { %v59_v22 = vadd.f32 1e-12, %v57_v21 }
 0x12e   :  { %385 = vrsqrt.f32 %v59_v22 }
 0x134   :  { %v384_v23 = vpop.eup %383 }
 0x135   :  { %v62_v24 = vmul.f32 %v384_v23, %v46_v6 }
 0x137   :  { %v70_v28 = vmul.f32 %v338_v25, %v62_v24 }
 0x138   :  { %v386_v26 = vpop.eup %385 }
 0x139   :  { %v63_v27 = vmul.f32 %v386_v26, %v47_v10  ;;  %v535_v31 = vadd.f32 %v339_v29, %v70_v28 }
 0x13b   :  { %v71_v30 = vmul.f32 %v338_v25, %v63_v27 }
 0x13d   :  { %v537_v32 = vadd.f32 %v339_v29, %v71_v30 }
 0x13f   :  { %v80_v33 = vpack.c.bf16 %v537_v32, %v535_v31 }
 0x141   :  { %361 = vmatmul.mubr.msk.bf16.vlgmr.msra.gmra.mrb[0].mxu0 %vm36_vm0, %v80_v33 }
 0x214   :  { %v141_v36 = vpop.f32.mrb[0].mxu0 }
 0x215   :  { %v142_v37 = vadd.f32 %v340_v35, %v141_v36  ;;  %v362_v38 = vpop.f32.mrb[1].mxu0 }
 0x216   :  { %v144_v39 = vpop.f32.mrb[2].mxu0 }
 0x217   :  { %v145_v40 = vadd.f32 %v340_v35, %v144_v39  ;;  %v363_v41 = vpop.f32.mrb[3].mxu0  ;;  %387 = vtanh.f32 %v142_v37 }
 0x219   :  { %389 = vtanh.f32 %v145_v40 }
 0x221   :  { %v388_v42 = vpop.eup %387 }
 0x223   :  { %v390_v43 = vpop.eup %389 }
 0x224   :  { %v150_v44 = vpack.c.bf16 %v390_v43, %v388_v42 }
 0x226   :  { %367 = vmatmul.mubr.msk.bf16.vlgmr.msra.gmra.mrb[0].mxu1 %vm166_vm2, %v150_v44 }
 0x2f9   :  { %v204_v46 = vpop.f32.mrb[0].mxu1 }
 0x2fa   :  { %v205_v47 = vadd.f32 %v344_v45, %v204_v46  ;;  %v368_v48 = vpop.f32.mrb[1].mxu1 }
 0x2fb   :  { %v207_v49 = vpop.f32.mrb[2].mxu1 }
 0x2fc   :  { %212 = vst.msk [vmem:[%s591_s8] sm:$0xff] %vm211_vm3, %v205_v47  ;;  %v208_v50 = vadd.f32 %v344_v45, %v207_v49  ;;  %216 = vrot.lane.b32.xlu0 %v205_v47, %s457_s23  ;;  %v369_v51 = vpop.f32.mrb[3].mxu1 }
 0x2fe   :  { %213 = vst.msk [vmem:[%s591_s8 + $0x8] sm:$0xff] %vm211_vm3, %v208_v50  ;;  %218 = vrot.lane.b32.xlu1 %v208_v50, %s457_s23  ;;  %s324_s8 = sshll.u32 %s459_s6, 4  ;;  %s325_s8 = int_to_ptr.vmem [resolvable:$true] %s324_s8 }
 0x2ff   :  { %s407_s26 = scalar_lea.vmem %s325_s8, 16  ;;  %s411_s27 = scalar_lea.vmem %s325_s8, 32 }
 0x300   :  { %p408_p0 = scmp.ne.s32.totalorder %s325_s8, %s407_s26  ;;  %p412_p1 = scmp.lt.s32.totalorder %s325_s8, %s325_s8 }
 0x301   :  { %p413_p2 = scmp.lt.s32.totalorder %s411_s27, %s407_s26 }
 0x303   :  { %p414_p3 = por %p413_p2, %p412_p1 }
 0x305   :  { %p415_p4 = pnand %p414_p3, %p408_p0 }
 0x36e   :  { %v217_v53 = vpop.permute.xlu0 %216 }
 0x36f   :  { %v222_v54 = vsub.f32 %v205_v47, %v217_v53 }
 0x370   :  { %v219_v55 = vpop.permute.xlu1 %218 }
 0x371   :  { %v224_v56 = vmul.f32 1.442695, %v222_v54  ;;  %v223_v57 = vsub.f32 %v208_v50, %v219_v55 }
 0x373   :  { %391 = vpow2.f32 %v224_v56  ;;  %v226_v58 = vmul.f32 1.442695, %v223_v57 }
 0x375   :  { %393 = vpow2.f32 %v226_v58 }
 0x37d   :  { %v392_v59 = vpop.eup %391 }
 0x37e   :  { %v228_v60 = vadd.f32 1.0, %v392_v59 }
 0x37f   :  { %v394_v61 = vpop.eup %393 }
 0x380   :  { %395 = vrcp.f32 %v228_v60  ;;  %v229_v62 = vadd.f32 1.0, %v394_v61 }
 0x382   :  { %397 = vrcp.f32 %v229_v62 }
 0x38a   :  { %v396_v63 = vpop.eup %395 }
 0x38b   :  { %238 = vperm.xlu1 %378, %v396_v63   ;;  %v234_v0 = vsub.f32 1.0, %v396_v63  ;;  %v272_v1 = vadd.f32 1e-08, %v396_v63 }
 0x38c   :  { %v398_v2 = vpop.eup %397 }
 0x38d   :  { %v235_v3 = vsub.f32 1.0, %v398_v2  ;;  %v273_v4 = vadd.f32 1e-08, %v398_v2  ;;  %399 = vlog2.f32 %v272_v1  ;;  %v280_v5 = vadd.f32 1e-08, %v234_v0 }
 0x38f   :  { %243 = vperm.xlu1 %378, %v398_v2   ;;  %401 = vlog2.f32 %v273_v4  ;;  %v281_v6 = vadd.f32 1e-08, %v235_v3 }
 0x390   :  { %403 = vlog2.f32 %v280_v5 }
 0x391   :  { %405 = vlog2.f32 %v281_v6 }
 0x397   :  { %v400_v7 = vpop.eup %399 }
 0x398   :  { %v275_v9 = vmul.f32 0.6931472, %v400_v7 }
 0x399   :  { %v402_v8 = vpop.eup %401 }
 0x39a   :  { %v404_v10 = vpop.eup %403  ;;  %v277_v11 = vmul.f32 0.6931472, %v402_v8  ;;  %v278_v15 = vmul.f32 %v396_v63, %v275_v9 }
 0x39b   :  { %v406_v12 = vpop.eup %405  ;;  %v283_v13 = vmul.f32 0.6931472, %v404_v10 }
 0x39c   :  { %v285_v14 = vmul.f32 0.6931472, %v406_v12  ;;  %v279_v17 = vmul.f32 %v398_v2, %v277_v11 }
 0x39d   :  { %v286_v16 = vmul.f32 %v283_v13, %v234_v0 }
 0x39e   :  { %v287_v18 = vmul.f32 %v285_v14, %v235_v3 }
 0x39f   :  { %v288_v19 = vadd.f32 %v286_v16, %v278_v15 }
 0x3a0   :  { %v289_v20 = vadd.f32 %v287_v18, %v279_v17 }
 0x3a1   :  { %v293_v21 = vsel %vm292_vm4, %v288_v19, 0.0 }
 0x3a2   :  { %v294_v22 = vsel %vm292_vm4, %v289_v20, 0.0 }
 0x3a3   :  { %v295_v23 = vadd.f32 %v294_v22, %v293_v21 }
 0x3a5   :  { %v296_v24 = vrot.slane %v295_v23, 4 }
 0x3a7   :  { %v297_v25 = vadd.f32 %v296_v24, %v295_v23 }
 0x3a9   :  { %v298_v26 = vrot.slane %v297_v25, 2 }
 0x3ab   :  { %v299_v27 = vadd.f32 %v298_v26, %v297_v25 }
 0x3ad   :  { %v300_v28 = vrot.slane %v299_v27, 1 }
 0x3af   :  { %v301_v29 = vadd.f32 %v300_v28, %v299_v27 }
 0x3b1   :  { %303 = vst.msk [vmem:[#allocation4] sm:$0x1] %vm302_vm5, %v301_v29 }
 0x3b2   :  { %418 = shalt.err (!%p415_p4)
}
 0x3b3   :  { %s419_s30 = scalar_lea.hbm %s592_s9, 16 }
 0x3b4   :  { %p420_p5 = scmp.ne.s32.totalorder %s592_s9, %s419_s30  ;;  %p423_p6 = scmp.lt.u32.totalorder %s419_s30, %s592_s9 }
 0x3b6   :  { %p425_p7 = pnand %p423_p6, %p420_p5 }
 0x3b8   :  { %428 = shalt.err (!%p425_p7)
}
 0x3b9   :  { %327 = dma.vmem_to_hbm [thread:$0]  %s325_s8, 16, %s592_s9, [#allocation5]   ;;  %vm256_vm6 = vcmask 257024  }
 0x3ba   :  { %s460_s15 = smov [#allocation2]  }
 0x3bb   :  { %s309_s16 = sshll.u32 %s460_s15, 4  ;;  %s310_s16 = int_to_ptr.vmem [resolvable:$true] %s309_s16 }
 0x3bc   :  { %s429_s17 = scalar_lea.vmem %s310_s16, 128  ;;  %p434_p9 = scmp.lt.s32.totalorder %s310_s16, %s310_s16 }
 0x3bd   :  { %p430_p8 = scmp.ne.s32.totalorder %s310_s16, %s429_s17  ;;  %p435_p10 = scmp.lt.s32.totalorder %s429_s17, %s429_s17 }
 0x3bf   :  { %p436_p11 = por %p435_p10, %p434_p9 }
 0x3c1   :  { %p437_p12 = pnand %p436_p11, %p430_p8 }
 0x40a   :  { %v239_v30 = vpop.permute.xlu1 %238 }
 0x40b   :  { %v246_v33 = vmul.f32 %v239_v30, %v535_v31 }
 0x40d   :  { %v349_v34 = vpack.c.bf16 %v246_v33, %v246_v33 }
 0x40e   :  { %v244_v35 = vpop.permute.xlu1 %243 }
 0x40f   :  { %257 = vst.msk [vmem:[#allocation2] sm:$0xf] %vm256_vm6, %v349_v34  ;;  %v247_v36 = vmul.f32 %v244_v35, %v537_v32 }
 0x411   :  { %v350_v37 = vpack.c.bf16 %v247_v36, %v247_v36 }
 0x413   :  { %258 = vst.msk [vmem:[#allocation2 + $0x4] sm:$0xf] %vm256_vm6, %v350_v37 }
 0x414   :  { %440 = shalt.err (!%p437_p12)
}
 0x415   :  { %s441_s18 = scalar_lea.hbm %s590_s7, 128 }
 0x416   :  { %p442_p13 = scmp.ne.s32.totalorder %s590_s7, %s441_s18  ;;  %p445_p0 = scmp.lt.u32.totalorder %s441_s18, %s590_s7 }
 0x418   :  { %p447_p1 = pnand %p445_p0, %p442_p13 }
 0x41a   :  { %450 = shalt.err (!%p447_p1)
}
 0x41b   :  { %s461_s2 = smov 64   ;;  %s462_s5 = smov 4  }
 0x41c   :  { %315 = dma.vmem_to_hbm [thread:$0]  %s310_s16, 128, %s590_s7, [#allocation3], %s461_s2, %s461_s2, %s462_s5  }
 0x41d   :  { %451 = dma.done.wait [#allocation3], 128  }
 0x41e   :  { %452 = vsyncadd [#allocation3], 4294967168 }
 0x41f   :  { %453 = dma.done.wait [#allocation5], 16  }
 0x420   :  { %454 = vsyncadd [#allocation5], 4294967280 }
 0x421   :  { %336 = vsyncpa [#allocation3], 1 }
 0x422   :  { %337 = vsyncpa [#allocation5], 1 }

</bundles_post_ra>
